<compile_context>
chip_gen: v7x
topology: tpu7x:2x2x1
jax: 0.10.0
libtpu: 0.0.40
codegen_flags: <defaults>
</compile_context>

<pallas_src>
import jax
import jax.numpy as jnp
from jax import lax
from jax.experimental import pallas as pl
from jax.experimental.pallas import tpu as pltpu


def _attention_kernel(x_ref, w_ref, o_ref):
    # x_ref: (BT, S, H)   w_ref: (NH, H)   o_ref: (BT, NH, S)
    w = w_ref[...].astype(jnp.float32)                     # (NH, H)
    bt = x_ref.shape[0]
    for bi in range(bt):                                   # static, small unroll
        t = jnp.tanh(x_ref[bi].astype(jnp.float32))        # (S, H) in f32
        # (NH, H) . (S, H) contracting H -> (NH, S): W consumed in native layout
        # (no .T / XLU transpose); S lands on the lane axis.
        logits = lax.dot_general(
            w, t,
            dimension_numbers=(((1,), (1,)), ((), ())),
            preferred_element_type=jnp.float32)
        # softmax over the sequence dimension (last / lane axis here).
        m = jnp.max(logits, axis=-1, keepdims=True)
        e = jnp.exp(logits - m)
        s = jnp.sum(e, axis=-1, keepdims=True)
        att = e * pl.reciprocal(s, approx=False)           # exact: 1e-5 tolerance
        o_ref[bi] = att.astype(o_ref.dtype)


def _pick_batch_tile(B, S, H, NH, in_itemsize, out_itemsize):
    """Largest divisor of B that (a) keeps the double-buffered tile within a
    modest VMEM budget, (b) caps the static unroll, and (c) leaves >=2 grid
    steps when B >= 2 so v7x's two TensorCores both get work."""
    budget = 8 << 20  # bytes for the per-step x tile (double-buffered)
    per_b = 2 * S * H * in_itemsize + 2 * NH * S * out_itemsize
    cap = max(1, min(8, B, budget // max(per_b, 1)))
    bt = 1
    for d in range(1, cap + 1):
        if B % d == 0 and (B // d) >= min(2, B):
            bt = d
    return bt


def attention_1(x, w, *, batch_tile=None, out_dtype=None):
    """x: [B, S, H], w: [NH, H] (PyTorch nn.Linear weight layout).
    Returns softmax(tanh(x) @ W^T, axis=1) of shape [B, S, NH]."""
    B, S, H = x.shape
    NH, H2 = w.shape
    assert H == H2
    out_dtype = jnp.dtype(out_dtype) if out_dtype is not None else x.dtype

    if batch_tile is None:
        batch_tile = _pick_batch_tile(
            B, S, H, NH, jnp.dtype(x.dtype).itemsize, out_dtype.itemsize)
    BT = int(batch_tile)
    assert B % BT == 0, "batch must be divisible by batch_tile"
    grid_b = B // BT

    # VMEM budget: double-buffered x + out tiles, the (small) weight, and
    # headroom for the f32 intermediates (tanh / logits / exp).
    vmem_bytes = (2 * BT * S * H * jnp.dtype(x.dtype).itemsize
                  + 2 * BT * NH * S * out_dtype.itemsize
                  + 2 * NH * H * jnp.dtype(w.dtype).itemsize
                  + 4 * BT * S * H + 8 * BT * NH * S)
    vmem_limit = int(min(100 << 20, max(4 << 20, 2 * vmem_bytes)))

    # Kernel emits [B, NH, S] (S lane-dense, unmasked stores); transpose back
    # to the module's [B, S, NH] in plain JAX.
    out_t = pl.pallas_call(
        _attention_kernel,
        out_shape=jax.ShapeDtypeStruct((B, NH, S), out_dtype),
        grid_spec=pltpu.PrefetchScalarGridSpec(
            num_scalar_prefetch=0,
            grid=(grid_b,),
            in_specs=[
                pl.BlockSpec((BT, S, H), lambda b: (b, 0, 0)),
                # constant index_map: the tiny weight is DMAed once, not per step
                pl.BlockSpec((NH, H), lambda b: (0, 0)),
            ],
            out_specs=pl.BlockSpec((BT, NH, S), lambda b: (b, 0, 0)),
        ),
        compiler_params=pltpu.CompilerParams(
            dimension_semantics=("parallel",),
            vmem_limit_bytes=vmem_limit),
    )(x, w)
    return jnp.transpose(out_t, (0, 2, 1))


def attention_1_ref(x, w):
    # Pure-JAX reference for correctness checking.
    logits = jnp.einsum("bsh,nh->bsn", jnp.tanh(x), w)
    return jax.nn.softmax(logits, axis=1)


if __name__ == "__main__":
    # Small shapes consistent with the module's forward signature.
    batch, seq_len, hidden_dim = 2, 8, 32
    num_hops = 4

    key = jax.random.PRNGKey(0)
    kx, kw = jax.random.split(key)
    x = jax.random.normal(kx, (batch, seq_len, hidden_dim), dtype=jnp.float32)
    # Deterministic parameter init (nn.Linear(hidden_dim, num_hops, bias=False)).
    w = (jax.random.uniform(kw, (num_hops, hidden_dim), dtype=jnp.float32) - 0.5) \
        * (2.0 / jnp.sqrt(hidden_dim))

    ref = attention_1_ref(x, w)

    # f32 path, auto batch tile.
    out = attention_1(x, w)
    jax.block_until_ready(out)
    assert out.shape == (batch, seq_len, num_hops)
    assert jnp.allclose(out, ref, atol=1e-5, rtol=1e-5), "mismatch vs reference"
    assert jnp.allclose(jnp.sum(out, axis=1), 1.0, atol=1e-5)

    # Batch-fused path (BT = B, single grid step).
    out_bt = attention_1(x, w, batch_tile=batch)
    jax.block_until_ready(out_bt)
    assert jnp.allclose(out_bt, ref, atol=1e-5, rtol=1e-5), "mismatch (batch_tile=B)"

    # bf16 I/O path (halves HBM traffic; compute stays f32 inside the kernel).
    out_bf16 = attention_1(x.astype(jnp.bfloat16), w.astype(jnp.bfloat16))
    jax.block_until_ready(out_bf16)
    assert out_bf16.dtype == jnp.bfloat16
    assert jnp.allclose(out_bf16.astype(jnp.float32), ref, atol=2e-2), "bf16 mismatch"

    print("KERNEL_OK")
</pallas_src>

<mosaic_0001>
module attributes {stable_mosaic.version = 11 : i64} {
  func.func @_attention_kernel(%arg0: i32, %arg1: memref<1x8x32xf32, #tpu.memory_space<vmem>>, %arg2: memref<4x32xf32, #tpu.memory_space<vmem>>, %arg3: memref<1x4x8xf32, #tpu.memory_space<vmem>>) attributes {dimension_semantics = [#tpu.dimension_semantics<parallel>], iteration_bounds = array<i64: 2>, scalar_prefetch = 0 : i64, scratch_operands = 0 : i64, tpu.core_type = #tpu.core_type<tc>, window_params = [{transform_indices = @transform_0, window_bounds = array<i64: 1, 8, 32>}, {pipeline_mode = #tpu.pipeline_mode<synchronous>, transform_indices = @transform_1, window_bounds = array<i64: 4, 32>}, {transform_indices = @transform_2, window_bounds = array<i64: 1, 4, 8>}]} {
    %c0 = arith.constant 0 : index
    %c0_0 = arith.constant 0 : index
    %0 = vector.load %arg2[%c0, %c0_0] : memref<4x32xf32, #tpu.memory_space<vmem>>, vector<4x32xf32>
    %c0_1 = arith.constant 0 : index
    %c0_2 = arith.constant 0 : index
    %c0_3 = arith.constant 0 : index
    %1 = vector.load %arg1[%c0_1, %c0_2, %c0_3] : memref<1x8x32xf32, #tpu.memory_space<vmem>>, vector<1x8x32xf32>
    %2 = vector.shape_cast %1 : vector<1x8x32xf32> to vector<8x32xf32>
    %3 = math.tanh %2 : vector<8x32xf32>
    %cst = arith.constant dense<0.000000e+00> : vector<4x8xf32>
    %4 = tpu.matmul %0, %3, %cst {dimension_numbers = #tpu.dot_dimension_numbers<[1], [1], [0], [0], [0, 0, 1, 0], [], []>} : vector<4x32xf32>, vector<8x32xf32>, vector<4x8xf32> -> vector<4x8xf32>
    %cst_4 = arith.constant dense<0xFF800000> : vector<4xf32>
    %5 = vector.multi_reduction <maximumf>, %4, %cst_4 [1] : vector<4x8xf32> to vector<4xf32>
    %6 = vector.shape_cast %5 : vector<4xf32> to vector<4x1xf32>
    %7 = vector.broadcast %6 : vector<4x1xf32> to vector<4x8xf32>
    %8 = arith.subf %4, %7 : vector<4x8xf32>
    %9 = math.exp %8 : vector<4x8xf32>
    %cst_5 = arith.constant dense<0.000000e+00> : vector<4xf32>
    %10 = vector.multi_reduction <add>, %9, %cst_5 [1] : vector<4x8xf32> to vector<4xf32>
    %11 = vector.shape_cast %10 : vector<4xf32> to vector<4x1xf32>
    %12 = tpu.reciprocal %11 : vector<4x1xf32> -> vector<4x1xf32>
    %13 = vector.broadcast %12 : vector<4x1xf32> to vector<4x8xf32>
    %14 = arith.mulf %9, %13 : vector<4x8xf32>
    %c0_6 = arith.constant 0 : index
    %c0_7 = arith.constant 0 : index
    %c0_8 = arith.constant 0 : index
    %15 = vector.load %arg3[%c0_6, %c0_7, %c0_8] : memref<1x4x8xf32, #tpu.memory_space<vmem>>, vector<1x4x8xf32>
    %16 = vector.shape_cast %15 : vector<1x4x8xf32> to vector<4x8xf32>
    %17 = vector.shape_cast %14 : vector<4x8xf32> to vector<1x4x8xf32>
    tpu.vector_store %arg3[%c0_6, %c0_7, %c0_8], %17 {strides = array<i32>} : memref<1x4x8xf32, #tpu.memory_space<vmem>>, vector<1x4x8xf32>,
    return
  }
  func.func @transform_0(%arg0: i32) -> (i32, i32, i32) {
    %c0_i32 = arith.constant 0 : i32
    %c0_i32_0 = arith.constant 0 : i32
    %c0_i32_1 = arith.constant 0 : i32
    return %arg0, %c0_i32, %c0_i32_0 : i32, i32, i32
  }
  func.func @transform_1(%arg0: i32) -> (i32, i32) {
    %c0_i32 = arith.constant 0 : i32
    %c0_i32_0 = arith.constant 0 : i32
    %c0_i32_1 = arith.constant 0 : i32
    return %c0_i32, %c0_i32_0 : i32, i32
  }
  func.func @transform_2(%arg0: i32) -> (i32, i32, i32) {
    %c0_i32 = arith.constant 0 : i32
    %c0_i32_0 = arith.constant 0 : i32
    %c0_i32_1 = arith.constant 0 : i32
    return %arg0, %c0_i32, %c0_i32_0 : i32, i32, i32
  }
}

</mosaic_0001>

<bundles_post_ra>
// kernel: tpu_custom_call.1
= control target key start
LH: loop header
LB: loop body
LE: loop exit
PB: predicated region body
PF: predicated region fallthrough
CT: control target
= control target key end

     0   :  { %7 = vsyncpa [#allocation3], 0  ;;  %s802_s0 = inlined_call_operand.hbm [shape: f32[2,8,32], index: 0, kind: input, shape index: {}]   ;;  %s803_s1 = inlined_call_operand.hbm [shape: f32[4,32], index: 1, kind: input, shape index: {}]   ;;  %s804_s2 = inlined_call_operand.hbm [shape: f32[2,4,8], index: 2, kind: output, shape index: {}]  }
   0x1   :  { %9 = vsyncpa [#allocation3 + $0x1], 0 }
   0x2   :  { %10 = vsyncpa [#allocation6], 0 }
   0x3   :  { %11 = vsyncpa [#allocation4], 0 }
   0x4   :  { %13 = vsyncpa [#allocation4 + $0x1], 0  ;;  %s597_s9 = smov 0   ;;  %s599_s10 = smov 0  }
   0x5   :  { %s601_s11 = smov 0   ;;  %s603_s12 = smov 0  }
   0x6 LB: > { %s618_s13 = sadd.s32 4294967295, %s575_s12   ;;  %s359_s14 = sadd.s32 4294967294, %s575_s12   ;;  %s575_s12 = sphi %s603_s12, %s828_s12   ;;  %s571_s11 = sphi %s601_s11, %s827_s11   ;;  %s567_s10 = sphi %s599_s10, %s826_s10   ;;  %s563_s9 = sphi %s597_s9, %s825_s9  }
   0x7   : > { %p39_p0 = scmp.ne.s32.totalorder %s567_s10, %s563_s9  ;;  %p805_p1 = scmp.eq.s32.totalorder %s618_s13, 0 }
   0x8   : > { %p90_p3 = scmp.eq.s32.totalorder %s359_s14, 1  ;;  %p360_p5 = scmp.ge.s32.totalorder %s575_s12, 1 }
   0x9   : > { %p627_p4 = por %p805_p1, %p39_p0  ;;  %p97_p7 = scmp.lt.s32.totalorder %s575_s12, 3 }
   0xa   : > { %p632_p6 = por %p90_p3, %p39_p0  ;;  %s577_s18 = smov [#allocation5]  }
   0xb   : > { %s808_s15 = scalar_select %p627_p4, 1, 0 }
   0xc   : > { %s809_s16 = scalar_select %p632_p6, 1, 0 }
   0xd   : > { %p637_p8 = pnand %p360_p5, %p97_p7  ;;  %s110_s19 = sshll.u32 %s577_s18, 4  ;;  %s111_s19 = int_to_ptr.vmem [resolvable:$true] %s110_s19 }
   0xe   : > { %s645_s20 = sadd.s32 1, %s575_s12   ;;  %s26_s24 = sadd.s32 1, %s571_s11 }
   0xf   : > { %s810_s17 = scalar_select %p637_p8, 1, 0 }
  0x10   : > { %p390_p10 = pneg %p637_p8  ;;  %s23_s22 = ssub.s32 %s575_s12, %s645_s20 }
  0x11   : > { %p655_p12 = scmp.eq.s32.totalorder %s23_s22, 0  ;;  %s447_s27 = scalar_lea.hbm %s803_s1, 64 }
  0x12   : > { %p649_p11 = pnand %p390_p10, %p805_p1  ;;  %p448_p0 = scmp.ne.s32.totalorder %s803_s1, %s447_s27 }
  0x13   : > { %s812_s23 = scalar_select %p655_p12, 1, 0 }
  0x14   : > { %p449_p3 = pneg %p649_p11  ;;  %p454_p10 = scmp.lt.u32.totalorder %s447_s27, %s803_s1 }
  0x16   : > { %p450_p5 = pnand %p449_p3, %p448_p0 }
  0x18   : > { %p451_p7 = pneg %p450_p5 }
  0x1a   : > { %p456_p9 = pnand %p454_p10, %p451_p7 }
  0x1c   : > { %459 = shalt.err (!%p456_p9)
}
  0x1d   : > { %s460_s4 = scalar_lea.vmem %s111_s19, 64  ;;  %p468_p6 = scmp.lt.s32.totalorder %s111_s19, %s111_s19 }
  0x1e   : > { %p461_p1 = scmp.ne.s32.totalorder %s111_s19, %s460_s4  ;;  %p469_p4 = scmp.lt.s32.totalorder %s460_s4, %s460_s4 }
  0x20   : > { %p463_p2 = pnand %p461_p1, %p449_p3  ;;  %p470_p8 = por %p469_p4, %p468_p6 }
  0x22   : > { %p464_p13 = pneg %p463_p2 }
  0x24   : > { %p471_p12 = pnand %p470_p8, %p464_p13 }
  0x26   : > { %474 = shalt.err (!%p471_p12)
}
  0x27   : > { %393 = dma.hbm_to_vmem [thread:$0]  (!%p649_p11), %s803_s1, 64, %s111_s19, [#allocation6]  }
  0x28   : > { %p813_p1 = scmp.ne.s32.totalorder %s812_s23, 0  ;;  %p34_p2 = scmp.eq.s32.totalorder %s575_s12, 0 }
  0x29   : > { %p814_p4 = scmp.ne.s32.totalorder %s571_s11, %s567_s10  ;;  %p815_p6 = scmp.eq.s32.totalorder %s618_s13, 1 }
  0x2a   : > { %s681_s7 = scalar_select %p813_p1, %s571_s11, %s26_s24  }
  0x2b   : > { %p689_p8 = por %p815_p6, %p814_p4  ;;  %p403_p9 = scmp.lt.s32.totalorder %s575_s12, 2 }
  0x2c   : > { %s121_s14 = sand.u32 1, %s571_s11   ;;  %p817_p12 = pmov %p814_p4 }
  0x2d   : > { %s363_s18 = sshll.u32 %s121_s14, 3  ;;  %s364_s21 = sshll.u32 %s575_s12, 7 }
  0x2e   : > { %p35_p13 = por %p34_p2, %p817_p12  ;;  %s702_s19 = scalar_lea.hbm %s802_s0, %s364_s21 }
  0x2f   : > { %s125_s23 = scalar_lea.vmem [#allocation2], %s363_s18  ;;  %s122_s27 = scalar_lea.sflag [#allocation3], %s121_s14 }
  0x30   : > { %s132_s24 = sshll.u32 %s125_s23, 4  ;;  %p704_p11 = pnand %p403_p9, %p35_p13  ;;  %s708_s24 = int_to_ptr.vmem [resolvable:$true] %s132_s24 }
  0x31   : > { %s475_s28 = scalar_lea.hbm %s702_s19, 128  ;;  %s480_s3 = scalar_lea.hbm %s802_s0, 256 }
  0x32   : > { %p476_p0 = scmp.ne.s32.totalorder %s702_s19, %s475_s28  ;;  %p477_p3 = pneg %p704_p11 }
  0x33   : > { %p481_p10 = scmp.lt.u32.totalorder %s702_s19, %s802_s0  ;;  %p482_p1 = scmp.lt.u32.totalorder %s480_s3, %s475_s28 }
  0x34   : > { %p478_p5 = pnand %p477_p3, %p476_p0  ;;  %p484_p4 = scmp.lt.u32.totalorder %s475_s28, %s702_s19 }
  0x35   : > { %p483_p2 = por %p482_p1, %p481_p10 }
  0x36   : > { %p479_p7 = pneg %p478_p5 }
  0x37   : > { %p485_p6 = por %p484_p4, %p483_p2 }
  0x39   : > { %p486_p9 = pnand %p485_p6, %p479_p7 }
  0x3b   : > { %489 = shalt.err (!%p486_p9)
}
  0x3c   : > { %s490_s6 = scalar_lea.vmem %s708_s24, 128  ;;  %s578_s14 = smov [#allocation2]  }
  0x3d   : > { %p491_p12 = scmp.ne.s32.totalorder %s708_s24, %s490_s6  ;;  %s495_s18 = sshll.u32 %s578_s14, 4  ;;  %s496_s18 = int_to_ptr.vmem [resolvable:$false] %s495_s18 }
  0x3e   : > { %s497_s21 = scalar_lea.vmem %s496_s18, 256  ;;  %p498_p5 = scmp.lt.s32.totalorder %s708_s24, %s496_s18 }
  0x3f   : > { %p493_p13 = pnand %p491_p12, %p477_p3  ;;  %p499_p10 = scmp.lt.s32.totalorder %s497_s21, %s490_s6 }
  0x41   : > { %p494_p0 = pneg %p493_p13  ;;  %p500_p1 = por %p499_p10, %p498_p5 }
  0x43   : > { %p501_p2 = pnand %p500_p1, %p494_p0 }
  0x45   : > { %504 = shalt.err (!%p501_p2)
}
  0x46   : > { %397 = dma.hbm_to_vmem [thread:$0]  (!%p704_p11), %s702_s19, 128, %s708_s24, %s122_s27  }
  0x47   : > { %p819_p7 = scmp.ne.s32.totalorder %s810_s17, 0 }
  0x48   : > { %s738_s22 = sand.u32 (!%p819_p7), 1, %s567_s10   ;;  %p820_p3 = scmp.ne.s32.totalorder (!%p819_p7), %s808_s15, 0 }
  0x49   : > { %141 = sbr.rel (%p819_p7) target bundleno = 639 (0x27f), region = 28  ;;  %s366_s25 = sshll.u32 (!%p819_p7), %s738_s22, 3 }
  0x4a   : > { %s144_s23 = scalar_lea.sflag (!%p819_p7), [#allocation3], %s738_s22  ;;  %s147_s28 = scalar_lea.vmem (!%p819_p7), [#allocation2], %s366_s25 }
  0x50   : > { %550 = dma.done.wait (%p820_p3), %s144_s23, 128  }
  0x51   : > { %552 = vsyncadd (%p820_p3), %s144_s23, 4294967168  ;;  %p821_p4 = scmp.eq.s32.totalorder %s618_s13, 0 }
  0x53   : > { %554 = dma.done.wait (%p821_p4), [#allocation6], 64   ;;  %p822_p11 = pmov %p821_p4 }
  0x54   : > { %v579_v0 = vmov 0.0   ;;  %vm580_vm0 = vmmov 0   ;;  %v173_v1 = vld [vmem:[%s147_s28] sm:$0xff]  ;;  %vm175_vm1 = vcmask 261120   ;;  %v172_v3 = vld [vmem:[#allocation5] sm:$0xf] }
  0x55   : > { %556 = vsyncadd (%p822_p11), [#allocation6], 4294967232  ;;  %377 = vmatprep.subr.mxu0 %v579_v0  ;;  %379 = vmatprep.mubr.msk.f32.mxu0 %vm580_vm0, %v579_v0  ;;  %441 = vtanh.f32 %v173_v1  ;;  %vm252_vm2 = vcmask 60416   ;;  %s368_s15 = sshll.u32 %s738_s22, 2  ;;  %s372_s17 = sshll.u32 %s618_s13, 6 }
  0x56   : > { %s171_s19 = scalar_lea.vmem [#allocation7], %s368_s15  ;;  %s757_s29 = scalar_lea.hbm %s804_s2, %s372_s17 }
  0x57   : > { %s279_s24 = sshll.u32 %s171_s19, 4  ;;  %s266_s30 = scalar_lea.sflag [#allocation4], %s738_s22  ;;  %s759_s24 = int_to_ptr.vmem [resolvable:$true] %s279_s24 }
  0x58   : > { %s505_s3 = scalar_lea.vmem %s759_s24, 64  ;;  %s581_s13 = smov [#allocation7]  }
  0x59   : > { %p506_p6 = scmp.ne.s32.totalorder %s759_s24, %s505_s3  ;;  %s509_s4 = sshll.u32 %s581_s13, 4  ;;  %s510_s4 = int_to_ptr.vmem [resolvable:$false] %s509_s4 }
  0x5a   : > { %s511_s5 = scalar_lea.vmem %s510_s4, 128  ;;  %p512_p13 = scmp.lt.s32.totalorder %s759_s24, %s510_s4 }
  0x5b   : > { %p507_p9 = pnand %p506_p6, %p689_p8  ;;  %p513_p0 = scmp.lt.s32.totalorder %s511_s5, %s505_s3 }
  0x5d   : > { %p508_p12 = pneg %p507_p9  ;;  %p514_p5 = por %p513_p0, %p512_p13 }
  0x5f   : > { %v442_v2 = vpop.eup %441  ;;  %p515_p10 = pnand %p514_p5, %p508_p12 }
  0x60   : > { %378 = vmatpush3.xpose.msk.msra.mxu0 %vm175_vm1, %v442_v2 }
  0x63   : > { %380 = vmatmul.mubr.msk.f32.vlgmr.msra.gmra.mrb[0].mxu0 %vm175_vm1, %v172_v3 }
 0x136   : > { %v248_v4 = vpop.f32.mrb[0].mxu0 }
 0x137   : > { %v381_v5 = vpop.f32.mrb[1].mxu0  ;;  %v253_v6 = vsel %vm252_vm2, %v248_v4, -inf }
 0x138   : > { %254 = vmax.xlane.f32.xlu0 %v253_v6 }
 0x1c5   : > { %v255_v7 = vpop.xlane.xlu0 %254 }
 0x1c6   : > { %v256_v8 = vsub.f32 %v248_v4, %v255_v7 }
 0x1c8   : > { %v257_v9 = vmul.f32 1.442695, %v256_v8 }
 0x1ca   : > { %443 = vpow2.f32 %v257_v9 }
 0x1d4   : > { %v444_v10 = vpop.eup %443 }
 0x1d5   : > { %v259_v11 = vsel %vm252_vm2, %v444_v10, 0.0 }
 0x1d6   : > { %260 = vadd.xlane.f32.xlu0 %v259_v11 }
 0x263   : > { %v261_v12 = vpop.xlane.xlu0 %260 }
 0x264   : > { %445 = vrcp.f32 %v261_v12 }
 0x26e   : > { %v446_v13 = vpop.eup %445 }
 0x26f   : > { %v263_v14 = vmul.f32 %v446_v13, %v444_v10 }
 0x271   : > { %264 = vst.msk [vmem:[%s171_s19] sm:$0xf] %vm252_vm2, %v263_v14 }
 0x272   : > { %518 = shalt.err (!%p515_p10)
}
 0x273   : > { %s519_s6 = scalar_lea.hbm %s757_s29, 64  ;;  %s523_s21 = scalar_lea.hbm %s804_s2, 128 }
 0x274   : > { %p520_p1 = scmp.ne.s32.totalorder %s757_s29, %s519_s6  ;;  %p524_p3 = scmp.lt.u32.totalorder %s757_s29, %s804_s2 }
 0x275   : > { %p525_p4 = scmp.lt.u32.totalorder %s523_s21, %s519_s6  ;;  %p527_p6 = scmp.lt.u32.totalorder %s519_s6, %s757_s29 }
 0x276   : > { %p521_p2 = pnand %p520_p1, %p689_p8 }
 0x277   : > { %p526_p11 = por %p525_p4, %p524_p3 }
 0x278   : > { %p522_p7 = pneg %p521_p2 }
 0x279   : > { %p528_p9 = por %p527_p6, %p526_p11 }
 0x27b   : > { %p529_p12 = pnand %p528_p9, %p522_p7 }
 0x27d   : > { %532 = shalt.err (!%p529_p12)
}
 0x27e   : > { %388 = dma.vmem_to_hbm [thread:$0]  (%p689_p8), %s759_s24, 64, %s757_s29, %s266_s30  }
 0x27f PF: > { %s291_s23 = sand.u32 1, %s563_s9   ;;  %p823_p13 = scmp.ne.s32.totalorder %s809_s16, 0 }
 0x280   : > { %p824_p0 = scmp.ge.s32.totalorder %s575_s12, 2  ;;  %s292_s28 = scalar_lea.sflag [#allocation4], %s291_s23 }
 0x282   : > { %p399_p5 = pnand %p824_p0, %p823_p13 }
 0x284   : > { %558 = dma.done.wait (!%p399_p5), %s292_s28, 64  }
 0x285   : > { %560 = vsyncadd (!%p399_p5), %s292_s28, 4294967232  ;;  %p16_p10 = scmp.ge.s32.totalorder %s645_s20, 4   ;;  %s825_s9 = smov %s567_s10 }
 0x286   : > { %s826_s10 = smov %s571_s11  ;;  %s827_s11 = smov %s681_s7 }
 0x287   : > { %s828_s12 = smov %s645_s20  ;;  %18 = sbr.rel (!%p16_p10) target bundleno = 6 (0x6), region = 77 }
 0x28e   :  { %297 = vsyncpa [#allocation3], 1 }
 0x28f   :  { %299 = vsyncpa [#allocation3 + $0x1], 1 }
 0x290   :  { %300 = vsyncpa [#allocation6], 1 }
 0x291   :  { %301 = vsyncpa [#allocation4], 1 }
 0x292   :  { %303 = vsyncpa [#allocation4 + $0x1], 1 }

</bundles_post_ra>
